<compile_context>
chip_gen: v7x
topology: tpu7x:2x2x1
jax: 0.10.0
libtpu: 0.0.40
codegen_flags: <defaults>
</compile_context>

<pallas_src>
import functools

import jax
import jax.numpy as jnp
from jax.experimental import pallas as pl
from jax.experimental.pallas import tpu as pltpu

EPS = 1e-6  # F.pairwise_distance default eps (added to the difference)

_VMEM_HEADROOM = 4 * 1024 * 1024  # leave room for compiler-internal scratch


def _vmem_limit_bytes():
    """Per-generation scoped-VMEM limit: 3/4 of physical, capped at 96 MiB."""
    cap = None
    try:
        cap = getattr(pltpu.get_tpu_info(), "vmem_capacity_bytes", None)
    except Exception:
        cap = None
    if not cap:
        cap = 64 * 1024 * 1024  # conservative fallback (v7x per-core VMEM)
    return int(min(96 * 1024 * 1024, (int(cap) * 3) // 4))


def _choose_tile_b(B, D, itemsize, tile_budget_bytes):
    """Biggest batch-tile that fits the VMEM budget, layout-aware."""
    dpad = -(-D // 128) * 128                      # lane padding of the feature dim
    sub = max(8, 32 // itemsize)                   # sublane multiple: 8 f32 / 16 bf16 / 32 int8
    in_bytes = 2 * 2 * dpad * itemsize             # x1,x2 tiles, each double-buffered
    n_f32_tmps = 2 + (2 if itemsize < 4 else 0)    # diff, diff^2 (+ upcast copies for sub-32-bit)
    tmp_bytes = n_f32_tmps * dpad * 4
    lab_bytes = 2 * 128 * 4                        # (tb,1) label block lane-pads to 128, 2 buffers
    col_bytes = 6 * 128 * 4                        # lane-sparse (tb,1) f32 temporaries
    per_row = in_bytes + tmp_bytes + lab_bytes + col_bytes
    tb = tile_budget_bytes // per_row
    tb = max(sub, (tb // sub) * sub)
    if B <= tb:
        return B                                   # single full-extent tile (always legal)
    return tb


def _choose_num_partials(num_tiles):
    """Split the reduction across 2 partials (cores on v7x) when it is free."""
    if num_tiles < 2:
        return 1
    if num_tiles % 2 == 0 or num_tiles >= 8:       # avoid a wasted phantom tile when cheap to
        return 2
    return 1


def _contrastive_loss_kernel(margin_ref, x1_ref, x2_ref, lab_ref, out_ref,
                             *, tiles_per_core, tile_b, total_b, needs_mask):
    c = pl.program_id(0)   # partial / core index   ("parallel")
    i = pl.program_id(1)   # tile within partial    ("arbitrary" reduction axis)

    @pl.when(i == 0)
    def _init():
        out_ref[...] = jnp.zeros_like(out_ref)

    margin = margin_ref[0]                                       # SMEM scalar
    x1 = x1_ref[...].astype(jnp.float32)
    x2 = x2_ref[...].astype(jnp.float32)
    lab = lab_ref[...].astype(jnp.float32)                       # [tb, 1]

    diff = x1 - x2 + EPS
    sq_dist = jnp.sum(diff * diff, axis=1, keepdims=True)        # [tb, 1]  (= d^2)
    d = jnp.sqrt(sq_dist)                                        # only needed for hinge
    hinge = jnp.maximum(margin - d, 0.0)
    per_row = (1.0 - lab) * sq_dist + lab * (hinge * hinge)      # [tb, 1]

    if needs_mask:
        # Padding exists somewhere in the padded (num_partials * tiles_per_core)
        # sweep.  Only the tile(s) whose row range extends past B pay for the
        # iota/compare/select; full tiles take the cheap branch.
        start = (c * tiles_per_core + i) * tile_b

        @pl.when(start + tile_b > total_b)
        def _partial_tile():
            row = start + jax.lax.broadcasted_iota(jnp.int32, per_row.shape, 0)
            masked = jnp.where(row < total_b, per_row, 0.0)
            out_ref[...] += jnp.sum(masked, keepdims=True).reshape(1, 1, 1)

        @pl.when(start + tile_b <= total_b)
        def _full_tile():
            out_ref[...] += jnp.sum(per_row, keepdims=True).reshape(1, 1, 1)
    else:
        out_ref[...] += jnp.sum(per_row, keepdims=True).reshape(1, 1, 1)


def contrastive_loss(output1, output2, label, margin=1.0, tile_b=None):
    B, D = output1.shape
    assert output2.shape == (B, D)
    assert label.shape == (B, 1)

    itemsize = jnp.dtype(output1.dtype).itemsize
    vmem_limit = _vmem_limit_bytes()
    if tile_b is None:
        tb = _choose_tile_b(B, D, itemsize, vmem_limit - _VMEM_HEADROOM)
    else:
        tb = min(int(tile_b), B)

    num_tiles = int(pl.cdiv(B, tb))
    nc = _choose_num_partials(num_tiles)           # partial sums (cores on v7x)
    tpc = int(pl.cdiv(num_tiles, nc))              # tiles per partial
    padded_rows = nc * tpc * tb
    needs_mask = padded_rows != B                  # static: full tiles skip mask code

    kernel = functools.partial(
        _contrastive_loss_kernel,
        tiles_per_core=tpc, tile_b=tb, total_b=B, needs_mask=needs_mask)

    margin_arr = jnp.asarray([margin], dtype=jnp.float32)

    def row_block(c, i, m):
        # Clamp so a phantom tile (odd tile count split over 2 partials) stays
        # in bounds; its rows are >= B and get fully masked in the kernel.
        return (jnp.minimum(c * tpc + i, num_tiles - 1), 0)

    cost = pl.CostEstimate(
        flops=5 * B * D,
        transcendentals=B,
        bytes_accessed=2 * B * D * itemsize
        + B * jnp.dtype(label.dtype).itemsize
        + 4,
    )

    partials = pl.pallas_call(
        kernel,
        out_shape=jax.ShapeDtypeStruct((nc, 1, 1), jnp.float32),
        grid_spec=pltpu.PrefetchScalarGridSpec(
            num_scalar_prefetch=1,
            grid=(nc, tpc),
            in_specs=[
                pl.BlockSpec((tb, D), row_block),
                pl.BlockSpec((tb, D), row_block),
                pl.BlockSpec((tb, 1), row_block),
            ],
            out_specs=pl.BlockSpec((1, 1, 1), lambda c, i, m: (c, 0, 0)),
        ),
        compiler_params=pltpu.CompilerParams(
            dimension_semantics=("parallel", "arbitrary"),
            vmem_limit_bytes=vmem_limit,
        ),
        cost_estimate=cost,
    )(margin_arr, output1, output2, label)

    return jnp.sum(partials) / B


def contrastive_loss_ref(output1, output2, label, margin=1.0):
    # Pure-JAX reference for validation (mirrors the PyTorch forward).
    d = jnp.sqrt(jnp.sum((output1.astype(jnp.float32)
                          - output2.astype(jnp.float32) + EPS) ** 2,
                         axis=1, keepdims=True))
    lab = label.astype(jnp.float32)
    return jnp.mean((1.0 - lab) * d ** 2
                    + lab * jnp.maximum(margin - d, 0.0) ** 2)


if __name__ == "__main__":
    key = jax.random.PRNGKey(0)
    k1, k2, k3 = jax.random.split(key, 3)

    # 1) Small siamese-feature-head shapes, single full-extent tile.
    B, D = 8, 32
    output1 = jax.random.normal(k1, (B, D), dtype=jnp.float32)
    output2 = jax.random.normal(k2, (B, D), dtype=jnp.float32)
    label = jax.random.bernoulli(k3, 0.5, (B, 1)).astype(jnp.float32)
    loss = contrastive_loss(output1, output2, label)
    jax.block_until_ready(loss)
    ref = contrastive_loss_ref(output1, output2, label)
    assert jnp.allclose(loss, ref, atol=1e-5, rtol=1e-5), (loss, ref)

    # 2) Tiled single-partial path with a partial trailing tile (mask branch).
    B2, D2, TB2 = 20, 32, 8
    o1 = jax.random.normal(k1, (B2, D2), dtype=jnp.float32)
    o2 = jax.random.normal(k2, (B2, D2), dtype=jnp.float32)
    lb = jax.random.bernoulli(k3, 0.5, (B2, 1)).astype(jnp.float32)
    loss2 = contrastive_loss(o1, o2, lb, margin=1.0, tile_b=TB2)
    jax.block_until_ready(loss2)
    ref2 = contrastive_loss_ref(o1, o2, lb)
    assert jnp.allclose(loss2, ref2, atol=1e-5, rtol=1e-5), (loss2, ref2)

    # 3) Two partial sums (parallel leading axis), exact split, no mask.
    B3, D3, TB3 = 64, 32, 16
    o1 = jax.random.normal(k1, (B3, D3), dtype=jnp.float32)
    o2 = jax.random.normal(k2, (B3, D3), dtype=jnp.float32)
    lb = jax.random.bernoulli(k3, 0.5, (B3, 1)).astype(jnp.float32)
    loss3 = contrastive_loss(o1, o2, lb, margin=0.75, tile_b=TB3)
    jax.block_until_ready(loss3)
    ref3 = contrastive_loss_ref(o1, o2, lb, margin=0.75)
    assert jnp.allclose(loss3, ref3, atol=1e-5, rtol=1e-5), (loss3, ref3)

    # 4) Two partial sums + partial trailing tile (mask on the global last tile).
    B4, D4, TB4 = 60, 32, 16
    o1 = jax.random.normal(k1, (B4, D4), dtype=jnp.float32)
    o2 = jax.random.normal(k2, (B4, D4), dtype=jnp.float32)
    lb = jax.random.bernoulli(k3, 0.5, (B4, 1)).astype(jnp.float32)
    loss4 = contrastive_loss(o1, o2, lb, margin=1.0, tile_b=TB4)
    jax.block_until_ready(loss4)
    ref4 = contrastive_loss_ref(o1, o2, lb)
    assert jnp.allclose(loss4, ref4, atol=1e-5, rtol=1e-5), (loss4, ref4)

    # 5) bf16 inputs (halved HBM traffic); kernel/ref both upcast to f32.
    o1b = output1.astype(jnp.bfloat16)
    o2b = output2.astype(jnp.bfloat16)
    loss5 = contrastive_loss(o1b, o2b, label)
    jax.block_until_ready(loss5)
    ref5 = contrastive_loss_ref(o1b, o2b, label)
    assert jnp.allclose(loss5, ref5, atol=1e-5, rtol=1e-5), (loss5, ref5)

    print("KERNEL_OK")
</pallas_src>

<mosaic_0001>
module attributes {stable_mosaic.version = 11 : i64} {
  func.func @_contrastive_loss_kernel(%arg0: i32, %arg1: i32, %arg2: memref<1xf32, #tpu.memory_space<smem>>, %arg3: memref<8x32xf32, #tpu.memory_space<vmem>>, %arg4: memref<8x32xf32, #tpu.memory_space<vmem>>, %arg5: memref<8x1xf32, #tpu.memory_space<vmem>>, %arg6: memref<1x1x1xf32, #tpu.memory_space<vmem>>) attributes {dimension_semantics = [#tpu.dimension_semantics<parallel>, #tpu.dimension_semantics<arbitrary>], iteration_bounds = array<i64: 1, 1>, scalar_prefetch = 1 : i64, scratch_operands = 0 : i64, tpu.core_type = #tpu.core_type<tc>, window_params = [{transform_indices = @transform_0, window_bounds = array<i64: 8, 32>}, {transform_indices = @transform_1, window_bounds = array<i64: 8, 32>}, {transform_indices = @transform_2, window_bounds = array<i64: 8, 1>}, {transform_indices = @transform_3, window_bounds = array<i64: 1, 1, 1>}]} {
    %c0_i32 = arith.constant 0 : i32
    %0 = arith.cmpi eq, %arg1, %c0_i32 : i32
    %1 = arith.extui %0 : i1 to i32
    %c0_i32_0 = arith.constant 0 : i32
    %2 = arith.cmpi ne, %1, %c0_i32_0 : i32
    scf.if %2 {
      %cst_17 = arith.constant 0.000000e+00 : f32
      %33 = vector.broadcast %cst_17 : f32 to vector<1x1x1xf32>
      %c0_18 = arith.constant 0 : index
      %c0_19 = arith.constant 0 : index
      %c0_20 = arith.constant 0 : index
      %34 = vector.load %arg6[%c0_18, %c0_19, %c0_20] : memref<1x1x1xf32, #tpu.memory_space<vmem>>, vector<1x1x1xf32>
      tpu.vector_store %arg6[%c0_18, %c0_19, %c0_20], %33 {strides = array<i32>} : memref<1x1x1xf32, #tpu.memory_space<vmem>>, vector<1x1x1xf32>,
    } else {
    }
    %c0 = arith.constant 0 : index
    %3 = memref.load %arg2[%c0] : memref<1xf32, #tpu.memory_space<smem>>
    %c0_1 = arith.constant 0 : index
    %c0_2 = arith.constant 0 : index
    %4 = vector.load %arg3[%c0_1, %c0_2] : memref<8x32xf32, #tpu.memory_space<vmem>>, vector<8x32xf32>
    %c0_3 = arith.constant 0 : index
    %c0_4 = arith.constant 0 : index
    %5 = vector.load %arg4[%c0_3, %c0_4] : memref<8x32xf32, #tpu.memory_space<vmem>>, vector<8x32xf32>
    %c0_5 = arith.constant 0 : index
    %c0_6 = arith.constant 0 : index
    %6 = vector.load %arg5[%c0_5, %c0_6] : memref<8x1xf32, #tpu.memory_space<vmem>>, vector<8x1xf32>
    %7 = arith.subf %4, %5 : vector<8x32xf32>
    %cst = arith.constant 9.99999997E-7 : f32
    %8 = vector.broadcast %cst : f32 to vector<8x32xf32>
    %9 = arith.addf %7, %8 : vector<8x32xf32>
    %10 = arith.mulf %9, %9 : vector<8x32xf32>
    %cst_7 = arith.constant dense<0.000000e+00> : vector<8xf32>
    %11 = vector.multi_reduction <add>, %10, %cst_7 [1] : vector<8x32xf32> to vector<8xf32>
    %12 = vector.shape_cast %11 : vector<8xf32> to vector<8x1xf32>
    %13 = math.sqrt %12 : vector<8x1xf32>
    %14 = vector.broadcast %3 : f32 to vector<8x1xf32>
    %15 = arith.subf %14, %13 : vector<8x1xf32>
    %cst_8 = arith.constant 0.000000e+00 : f32
    %16 = vector.broadcast %cst_8 : f32 to vector<8x1xf32>
    %17 = arith.maximumf %15, %16 : vector<8x1xf32>
    %cst_9 = arith.constant 1.000000e+00 : f32
    %18 = vector.broadcast %cst_9 : f32 to vector<8x1xf32>
    %19 = arith.subf %18, %6 : vector<8x1xf32>
    %20 = arith.mulf %19, %12 : vector<8x1xf32>
    %21 = arith.mulf %17, %17 : vector<8x1xf32>
    %22 = arith.mulf %6, %21 : vector<8x1xf32>
    %23 = arith.addf %20, %22 : vector<8x1xf32>
    %c0_10 = arith.constant 0 : index
    %c0_11 = arith.constant 0 : index
    %c0_12 = arith.constant 0 : index
    %24 = vector.load %arg6[%c0_10, %c0_11, %c0_12] : memref<1x1x1xf32, #tpu.memory_space<vmem>>, vector<1x1x1xf32>
    %25 = vector.shape_cast %23 : vector<8x1xf32> to vector<1x8x1xf32>
    %cst_13 = arith.constant dense<0.000000e+00> : vector<1xf32>
    %26 = vector.multi_reduction <add>, %25, %cst_13 [1, 2] : vector<1x8x1xf32> to vector<1xf32>
    %27 = vector.shape_cast %26 : vector<1xf32> to vector<1x1x1xf32>
    %28 = vector.extract %27[0, 0, 0] : f32 from vector<1x1x1xf32>
    %29 = vector.broadcast %28 : f32 to vector<1x1xf32>
    %30 = vector.shape_cast %29 : vector<1x1xf32> to vector<1x1x1xf32>
    %31 = arith.addf %24, %30 : vector<1x1x1xf32>
    %c0_14 = arith.constant 0 : index
    %c0_15 = arith.constant 0 : index
    %c0_16 = arith.constant 0 : index
    %32 = vector.load %arg6[%c0_14, %c0_15, %c0_16] : memref<1x1x1xf32, #tpu.memory_space<vmem>>, vector<1x1x1xf32>
    tpu.vector_store %arg6[%c0_14, %c0_15, %c0_16], %31 {strides = array<i32>} : memref<1x1x1xf32, #tpu.memory_space<vmem>>, vector<1x1x1xf32>,
    return
  }
  func.func @transform_0(%arg0: i32, %arg1: i32, %arg2: memref<1xf32, #tpu.memory_space<smem>>) -> (i32, i32) {
    %c1_i32 = arith.constant 1 : i32
    %0 = arith.muli %arg0, %c1_i32 : i32
    %1 = arith.addi %0, %arg1 : i32
    %c0_i32 = arith.constant 0 : i32
    %2 = arith.minsi %1, %c0_i32 : i32
    %c0_i32_0 = arith.constant 0 : i32
    %c0_i32_1 = arith.constant 0 : i32
    return %2, %c0_i32_0 : i32, i32
  }
  func.func @transform_1(%arg0: i32, %arg1: i32, %arg2: memref<1xf32, #tpu.memory_space<smem>>) -> (i32, i32) {
    %c1_i32 = arith.constant 1 : i32
    %0 = arith.muli %arg0, %c1_i32 : i32
    %1 = arith.addi %0, %arg1 : i32
    %c0_i32 = arith.constant 0 : i32
    %2 = arith.minsi %1, %c0_i32 : i32
    %c0_i32_0 = arith.constant 0 : i32
    %c0_i32_1 = arith.constant 0 : i32
    return %2, %c0_i32_0 : i32, i32
  }
  func.func @transform_2(%arg0: i32, %arg1: i32, %arg2: memref<1xf32, #tpu.memory_space<smem>>) -> (i32, i32) {
    %c1_i32 = arith.constant 1 : i32
    %0 = arith.muli %arg0, %c1_i32 : i32
    %1 = arith.addi %0, %arg1 : i32
    %c0_i32 = arith.constant 0 : i32
    %2 = arith.minsi %1, %c0_i32 : i32
    %c0_i32_0 = arith.constant 0 : i32
    %c0_i32_1 = arith.constant 0 : i32
    return %2, %c0_i32_0 : i32, i32
  }
  func.func @transform_3(%arg0: i32, %arg1: i32, %arg2: memref<1xf32, #tpu.memory_space<smem>>) -> (i32, i32, i32) {
    %c0_i32 = arith.constant 0 : i32
    %c0_i32_0 = arith.constant 0 : i32
    %c0_i32_1 = arith.constant 0 : i32
    return %arg0, %c0_i32, %c0_i32_0 : i32, i32, i32
  }
}

</mosaic_0001>

<bundles_post_ra>
// kernel: tpu_custom_call.1
= control target key start
LH: loop header
LB: loop body
LE: loop exit
PB: predicated region body
PF: predicated region fallthrough
CT: control target
= control target key end

     0   :  { %s261_s0 = inlined_call_operand.<no memory space> [shape: f32[1], index: 0, kind: input, shape index: {}]   ;;  %s262_s1 = inlined_call_operand.vmem [shape: f32[8,32], index: 1, kind: input, shape index: {}]   ;;  %s263_s2 = inlined_call_operand.vmem [shape: f32[8,32], index: 2, kind: input, shape index: {}]   ;;  %s264_s3 = inlined_call_operand.vmem [shape: f32[8,1], index: 3, kind: input, shape index: {}]   ;;  %s265_s4 = inlined_call_operand.hbm [shape: f32[1,1,1], index: 4, kind: output, shape index: {}]  }
   0x1   :  { %v105_v0 = vld [vmem:[%s262_s1] sm:$0xff] }
   0x2   :  { %v106_v1 = vld [vmem:[%s263_s2] sm:$0xff] }
   0x3   :  { %10 = vsyncpa [#allocation5], 0  ;;  %v108_v2 = vsub.f32 %v105_v0, %v106_v1  ;;  %vm111_vm0 = vcmask 261120   ;;  %v122_v10 = vstv %s261_s0  ;;  %v107_v12 = vld [vmem:[%s264_s3] sm:$0xff]  ;;  %vm131_vm3 = vcmask 7168   ;;  %s209_s0 = smov [#allocation4]  }
   0x4   :  { %v125_v16 = vsub.f32 1.0, %v107_v12  ;;  %vm102_vm4 = vcmask 0   ;;  %v208_v22 = vmov 0.0   ;;  %s152_s3 = sshll.u32 %s209_s0, 4  ;;  %s153_s3 = int_to_ptr.vmem [resolvable:$true] %s152_s3 }
   0x5   :  { %v109_v3 = vadd.f32 1e-06, %v108_v2  ;;  %103 = vst.msk [vmem:[#allocation4] sm:$0x1] %vm102_vm4, %v208_v22  ;;  %s184_s22 = scalar_lea.vmem %s153_s3, 16  ;;  %s188_s23 = scalar_lea.vmem %s153_s3, 32 }
   0x6   :  { %p185_p0 = scmp.ne.s32.totalorder %s153_s3, %s184_s22  ;;  %p189_p1 = scmp.lt.s32.totalorder %s153_s3, %s153_s3 }
   0x7   :  { %v110_v4 = vmul.f32 %v109_v3, %v109_v3  ;;  %p190_p2 = scmp.lt.s32.totalorder %s188_s23, %s184_s22 }
   0x9   :  { %v112_v5 = vsel %vm111_vm0, %v110_v4, 0.0  ;;  %p191_p3 = por %p190_p2, %p189_p1 }
   0xa   :  { %113 = vadd.xlane.f32.xlu0 %v112_v5 }
   0xb   :  { %p192_p4 = pnand %p191_p3, %p185_p0 }
   0xc   :  { %v130_v30 = vld [vmem:[#allocation4] sm:$0x1] }
  0x97   :  { %v114_v6 = vpop.xlane.xlu0 %113 }
  0x98   :  { %182 = vrsqrt.f32 %v114_v6  ;;  %vm117_vm1 = vcmp.eq.f32.partialorder %v114_v6, inf  ;;  %v120_v9 = vand.u32 2147483648, %v114_v6  ;;  %vm119_vm2 = vcmp.eq.f32.partialorder %v114_v6, 0.0 }
  0x99   :  { %v126_v18 = vmul.f32 %v125_v16, %v114_v6 }
  0xa2   :  { %v183_v7 = vpop.eup %182 }
  0xa3   :  { %v116_v8 = vmul.f32 %v183_v7, %v114_v6 }
  0xa5   :  { %v118_v11 = vsel %vm117_vm1, %v114_v6, %v116_v8 }
  0xa6   :  { %v121_v13 = vsel %vm119_vm2, %v120_v9, %v118_v11 }
  0xa7   :  { %v123_v14 = vsub.f32 %v122_v10, %v121_v13 }
  0xa9   :  { %v124_v15 = vmax.f32 %v123_v14, 0.0 }
  0xab   :  { %v127_v17 = vmul.f32 %v124_v15, %v124_v15 }
  0xad   :  { %v128_v19 = vmul.f32 %v127_v17, %v107_v12 }
  0xaf   :  { %v129_v20 = vadd.f32 %v128_v19, %v126_v18 }
  0xb1   :  { %v132_v21 = vsel %vm131_vm3, %v129_v20, 0.0 }
  0xb2   :  { %133 = vadd.xlane.f32.xlu0 %v132_v21 }
 0x13f   :  { %v134_v23 = vpop.xlane.xlu0 %133 }
 0x140   :  { %v135_v24 = vrot.slane %v134_v23, 4 }
 0x142   :  { %v136_v25 = vadd.f32 %v135_v24, %v134_v23 }
 0x144   :  { %v137_v26 = vrot.slane %v136_v25, 2 }
 0x146   :  { %v138_v27 = vadd.f32 %v137_v26, %v136_v25 }
 0x148   :  { %v139_v28 = vrot.slane %v138_v27, 1 }
 0x14a   :  { %v140_v29 = vadd.f32 %v139_v28, %v138_v27 }
 0x14c   :  { %178 = vpush %v140_v29 }
 0x17d   :  { %s179_s21 = spop %178 }
 0x17e   :  { %v142_v31 = vstv %s179_s21 }
 0x17f   :  { %v143_v32 = vadd.f32 %v142_v31, %v130_v30 }
 0x181   :  { %145 = vst.msk [vmem:[#allocation4] sm:$0x1] %vm102_vm4, %v143_v32 }
 0x182   :  { %195 = shalt.err (!%p192_p4)
}
 0x183   :  { %s196_s26 = scalar_lea.hbm %s265_s4, 16 }
 0x184   :  { %p197_p5 = scmp.ne.s32.totalorder %s265_s4, %s196_s26  ;;  %p200_p6 = scmp.lt.u32.totalorder %s196_s26, %s265_s4 }
 0x186   :  { %p202_p7 = pnand %p200_p6, %p197_p5 }
 0x188   :  { %205 = shalt.err (!%p202_p7)
}
 0x189   :  { %155 = dma.vmem_to_hbm [thread:$0]  %s153_s3, 16, %s265_s4, [#allocation5]  }
 0x18a   :  { %206 = dma.done.wait [#allocation5], 16  }
 0x18b   :  { %207 = vsyncadd [#allocation5], 4294967280 }
 0x18c   :  { %159 = vsyncpa [#allocation5], 1 }

</bundles_post_ra>
